<compile_context>
chip_gen: v6e
topology: v6e:2x2x1
jax: 0.10.0
libtpu: 0.0.40
codegen_flags: <defaults>
</compile_context>

<pallas_src>
import functools

import jax
import jax.numpy as jnp
from jax.experimental import pallas as pl
from jax.experimental.pallas import tpu as pltpu


# ----------------------------------------------------------------------------
# helpers
# ----------------------------------------------------------------------------
def _round_up(x, m):
    return ((x + m - 1) // m) * m


def _pick_tile(n, desired, align):
    """Largest t <= desired that divides n and is a multiple of `align`;
    falls back to the full dimension n (always a legal block size)."""
    t = min(desired, n)
    t -= t % align
    while t >= align:
        if n % t == 0:
            return t
        t -= align
    return n


# ----------------------------------------------------------------------------
# kernel 1: fold the (small) per-relation weight into the features
#           Y[r] = X @ W[r]           (bias handled separately, see below)
# ----------------------------------------------------------------------------
def _fold_weights_kernel(x_ref, w_ref, y_ref):
    y_ref[...] = jnp.dot(x_ref[...], w_ref[...],
                         preferred_element_type=jnp.float32)


# ----------------------------------------------------------------------------
# kernel 2: the hot loop
#   out[i-tile] = relu?( (1/R) * sum_{r,k} (A[r,i,k] * dsc[r,i] * ssc[r,k]) @ Y[r,k]
#                        + mean_r b[r] )
# Accumulates directly into the VMEM-resident output tile (no scratch).
# ----------------------------------------------------------------------------
def _rgcn_agg_kernel(a_ref, dsc_ref, ssc_ref, y_ref, bmean_ref, o_ref, *,
                     num_rel, apply_relu):
    r = pl.program_id(1)
    k = pl.program_id(2)

    @pl.when(jnp.logical_and(r == 0, k == 0))
    def _():
        o_ref[...] = jnp.zeros_like(o_ref)

    # Fused degree normalization on the VPU: A_hat tile = A * d_dst^-1/2 * d_src^-1/2
    a_hat = a_ref[...] * dsc_ref[...] * ssc_ref[...]          # (TM,TK)*(TM,1)*(1,TK)
    o_ref[...] += jnp.dot(a_hat, y_ref[...],
                          preferred_element_type=jnp.float32)

    @pl.when(jnp.logical_and(r == num_rel - 1,
                             k == pl.num_programs(2) - 1))
    def _():
        out = o_ref[...] * (1.0 / num_rel) + bmean_ref[...]
        if apply_relu:
            out = jnp.maximum(out, 0.0)
        o_ref[...] = out.astype(o_ref.dtype)


# ----------------------------------------------------------------------------
# wrapper: one HeteroGraphConv(mean) layer
# ----------------------------------------------------------------------------
def hetero_graphconv_mean(adj, dsc, ssc, x, w, b, *, apply_relu,
                          tm_hint=256, tk_hint=512):
    """adj: (R, N, N) raw 0/1 adjacency; dsc: (R, N, 1) rsqrt dst-degree;
    ssc: (R, 1, N) rsqrt src-degree; x: (N, Fin); w: (R, Fin, Fout);
    b: (R, 1, Fout). Returns (N, Fout) float32."""
    R, N, _ = adj.shape
    Fin = x.shape[1]
    Fout = w.shape[2]
    Fp = _round_up(Fout, 128)            # lane-dense output (zero-padded columns)

    if Fp != Fout:
        w = jnp.pad(w, ((0, 0), (0, 0), (0, Fp - Fout)))
        b = jnp.pad(b, ((0, 0), (0, 0), (0, Fp - Fout)))
    b_mean = jnp.mean(b, axis=0)         # (1, Fp): bias folded out of the reduction

    TM = _pick_tile(N, tm_hint, 8)       # dst-row tile (sublane axis)
    TK = _pick_tile(N, tk_hint, 128)     # src-col tile (lane axis of A)
    TMf = _pick_tile(N, 512, 8)          # row tile for the weight-fold kernel

    # --- stage 1: Y[r] = X @ W[r]  (tiny matmul, hoisted out of the hot loop) ---
    y = pl.pallas_call(
        _fold_weights_kernel,
        out_shape=jax.ShapeDtypeStruct((R, N, Fp), jnp.float32),
        grid_spec=pltpu.PrefetchScalarGridSpec(
            num_scalar_prefetch=0,
            grid=(R, N // TMf),
            in_specs=[
                pl.BlockSpec((TMf, Fin), lambda r, m: (m, 0)),
                pl.BlockSpec((pl.Squeezed(), Fin, Fp), lambda r, m: (r, 0, 0)),
            ],
            out_specs=pl.BlockSpec((pl.Squeezed(), TMf, Fp),
                                   lambda r, m: (r, m, 0)),
        ),
        compiler_params=pltpu.CompilerParams(
            dimension_semantics=("parallel", "parallel")),
    )(x, w)

    # --- stage 2: tiled, normalized-on-the-fly A @ Y reduction over (r, k) ---
    kernel = functools.partial(_rgcn_agg_kernel, num_rel=R,
                               apply_relu=apply_relu)
    out = pl.pallas_call(
        kernel,
        out_shape=jax.ShapeDtypeStruct((N, Fp), jnp.float32),
        grid_spec=pltpu.PrefetchScalarGridSpec(
            num_scalar_prefetch=0,
            grid=(N // TM, R, N // TK),          # reductions (r, k) last
            in_specs=[
                pl.BlockSpec((pl.Squeezed(), TM, TK),
                             lambda i, r, k: (r, i, k)),     # raw A[r] tile
                pl.BlockSpec((pl.Squeezed(), TM, 1),
                             lambda i, r, k: (r, i, 0)),     # rsqrt(deg_dst)
                pl.BlockSpec((pl.Squeezed(), 1, TK),
                             lambda i, r, k: (r, 0, k)),     # rsqrt(deg_src)
                pl.BlockSpec((pl.Squeezed(), TK, Fp),
                             lambda i, r, k: (r, k, 0)),     # Y[r] tile
                pl.BlockSpec((1, Fp),
                             lambda i, r, k: (0, 0)),        # mean bias (resident)
            ],
            out_specs=pl.BlockSpec((TM, Fp), lambda i, r, k: (i, 0)),
        ),
        compiler_params=pltpu.CompilerParams(
            dimension_semantics=("parallel", "arbitrary", "arbitrary"),
            vmem_limit_bytes=32 * 1024 * 1024),
    )(adj, dsc, ssc, y, b_mean)

    return out[:, :Fout]


# ----------------------------------------------------------------------------
# full model
# ----------------------------------------------------------------------------
def degree_scales(adj):
    """rsqrt of clamped in/out degrees (computed once, reused by both layers)."""
    deg_dst = jnp.maximum(jnp.sum(adj, axis=2), 1.0)   # in-degree of dst   (R, N)
    deg_src = jnp.maximum(jnp.sum(adj, axis=1), 1.0)   # out-degree of src  (R, N)
    dsc = jax.lax.rsqrt(deg_dst)[:, :, None]           # (R, N, 1)
    ssc = jax.lax.rsqrt(deg_src)[:, None, :]           # (R, 1, N)
    return dsc, ssc


def rgcn_forward(adj, x, params):
    """RGCN forward: conv1 -> relu -> conv2 (both hetero-mean-aggregated)."""
    dsc, ssc = degree_scales(adj)
    h = hetero_graphconv_mean(adj, dsc, ssc, x, params["w1"], params["b1"],
                              apply_relu=True)
    h = hetero_graphconv_mean(adj, dsc, ssc, h, params["w2"], params["b2"],
                              apply_relu=False)
    return h


# ----------------------------------------------------------------------------
# pure-JAX reference (same math, untiled) for correctness checking
# ----------------------------------------------------------------------------
def _reference_forward(adj, x, params):
    deg_dst = jnp.maximum(adj.sum(axis=2), 1.0)
    deg_src = jnp.maximum(adj.sum(axis=1), 1.0)
    a_hat = adj * jax.lax.rsqrt(deg_dst)[:, :, None] \
                * jax.lax.rsqrt(deg_src)[:, None, :]

    def layer(x, w, b, relu):
        y = jnp.einsum("nf,rfo->rno", x, w)
        h = jnp.einsum("rij,rjo->rio", a_hat, y).mean(axis=0) + b.mean(axis=0)
        return jnp.maximum(h, 0.0) if relu else h

    h = layer(x, params["w1"], params["b1"], True)
    return layer(h, params["w2"], params["b2"], False)


if __name__ == "__main__":
    # Small, deterministic synthetic problem.
    N = 16            # nodes (single node type)
    R = 3             # number of relations
    IN_F = 8          # in_features
    HID_F = 32        # hidden_features
    OUT_F = 16        # out_features

    key = jax.random.PRNGKey(0)
    k_adj, k_x, k_w1, k_b1, k_w2, k_b2 = jax.random.split(key, 6)

    # Dense per-relation adjacency (0/1), deterministic.
    adj = jax.random.bernoulli(k_adj, p=0.3, shape=(R, N, N)).astype(jnp.float32)

    # Node features.
    x = jax.random.normal(k_x, (N, IN_F), dtype=jnp.float32)

    # Per-relation GraphConv parameters (glorot-ish scaling), deterministic.
    params = {
        "w1": jax.random.normal(k_w1, (R, IN_F, HID_F), dtype=jnp.float32)
              * (1.0 / jnp.sqrt(IN_F)),
        "b1": jax.random.normal(k_b1, (R, 1, HID_F), dtype=jnp.float32) * 0.1,
        "w2": jax.random.normal(k_w2, (R, HID_F, OUT_F), dtype=jnp.float32)
              * (1.0 / jnp.sqrt(HID_F)),
        "b2": jax.random.normal(k_b2, (R, 1, OUT_F), dtype=jnp.float32) * 0.1,
    }

    out = jax.block_until_ready(rgcn_forward(adj, x, params))
    ref = jax.block_until_ready(_reference_forward(adj, x, params))

    assert out.shape == (N, OUT_F), out.shape
    assert jnp.allclose(out, ref, atol=2e-4, rtol=2e-4), "mismatch vs reference"

    print("KERNEL_OK")
</pallas_src>

<mosaic_0001>
module attributes {stable_mosaic.version = 11 : i64} {
  func.func @_fold_weights_kernel(%arg0: i32, %arg1: i32, %arg2: memref<16x8xf32, #tpu.memory_space<vmem>>, %arg3: memref<1x8x128xf32, #tpu.memory_space<vmem>>, %arg4: memref<1x16x128xf32, #tpu.memory_space<vmem>>) attributes {dimension_semantics = [#tpu.dimension_semantics<parallel>, #tpu.dimension_semantics<parallel>], iteration_bounds = array<i64: 3, 1>, scalar_prefetch = 0 : i64, scratch_operands = 0 : i64, tpu.core_type = #tpu.core_type<tc>, window_params = [{transform_indices = @transform_0, window_bounds = array<i64: 16, 8>}, {transform_indices = @transform_1, window_bounds = array<i64: 1, 8, 128>}, {transform_indices = @transform_2, window_bounds = array<i64: 1, 16, 128>}]} {
    %c0 = arith.constant 0 : index
    %c0_0 = arith.constant 0 : index
    %0 = vector.load %arg2[%c0, %c0_0] : memref<16x8xf32, #tpu.memory_space<vmem>>, vector<16x8xf32>
    %c0_1 = arith.constant 0 : index
    %c0_2 = arith.constant 0 : index
    %c0_3 = arith.constant 0 : index
    %1 = vector.load %arg3[%c0_1, %c0_2, %c0_3] : memref<1x8x128xf32, #tpu.memory_space<vmem>>, vector<1x8x128xf32>
    %2 = vector.shape_cast %1 : vector<1x8x128xf32> to vector<8x128xf32>
    %cst = arith.constant dense<0.000000e+00> : vector<16x128xf32>
    %3 = tpu.matmul %0, %2, %cst {dimension_numbers = #tpu.dot_dimension_numbers<[1], [0], [0], [1], [0, 0, 1, 1], [], []>} : vector<16x8xf32>, vector<8x128xf32>, vector<16x128xf32> -> vector<16x128xf32>
    %c0_4 = arith.constant 0 : index
    %c0_5 = arith.constant 0 : index
    %c0_6 = arith.constant 0 : index
    %4 = vector.load %arg4[%c0_4, %c0_5, %c0_6] : memref<1x16x128xf32, #tpu.memory_space<vmem>>, vector<1x16x128xf32>
    %5 = vector.shape_cast %4 : vector<1x16x128xf32> to vector<16x128xf32>
    %6 = vector.shape_cast %3 : vector<16x128xf32> to vector<1x16x128xf32>
    tpu.vector_store %arg4[%c0_4, %c0_5, %c0_6], %6 {strides = array<i32>} : memref<1x16x128xf32, #tpu.memory_space<vmem>>, vector<1x16x128xf32>,
    return
  }
  func.func @transform_0(%arg0: i32, %arg1: i32) -> (i32, i32) {
    %c0_i32 = arith.constant 0 : i32
    %c0_i32_0 = arith.constant 0 : i32
    return %arg1, %c0_i32 : i32, i32
  }
  func.func @transform_1(%arg0: i32, %arg1: i32) -> (i32, i32, i32) {
    %c0_i32 = arith.constant 0 : i32
    %c0_i32_0 = arith.constant 0 : i32
    %c0_i32_1 = arith.constant 0 : i32
    return %arg0, %c0_i32, %c0_i32_0 : i32, i32, i32
  }
  func.func @transform_2(%arg0: i32, %arg1: i32) -> (i32, i32, i32) {
    %c0_i32 = arith.constant 0 : i32
    %c0_i32_0 = arith.constant 0 : i32
    return %arg0, %arg1, %c0_i32 : i32, i32, i32
  }
}

</mosaic_0001>

<bundles_post_ra>
// kernel: tpu_custom_call.1
= control target key start
LH: loop header
LB: loop body
LE: loop exit
PB: predicated region body
PF: predicated region fallthrough
CT: control target
= control target key end

     0   :  { %7 = vsyncpa [#allocation3], 0  ;;  %s664_s0 = inlined_call_operand.vmem [shape: f32[16,8], index: 0, kind: input, shape index: {}]   ;;  %s665_s1 = inlined_call_operand.vmem [shape: f32[3,8,128], index: 1, kind: input, shape index: {}]   ;;  %s666_s2 = inlined_call_operand.hbm [shape: f32[3,16,128], index: 2, kind: output, shape index: {}]  }
   0x1   :  { %9 = vsyncpa [#allocation3 + $0x1], 0  ;;  %s544_s9 = smov 0   ;;  %s546_s10 = smov 0  }
   0x2   :  { %s548_s11 = smov 0   ;;  %s550_s12 = smov 0  }
   0x3   :  { %s552_s13 = smov 0   ;;  %s554_s14 = smov 0  }
   0x4 LB: > { %s367_s15 = sadd.s32 4294967295, %s524_s14   ;;  %s368_s16 = sadd.s32 4294967294, %s524_s14   ;;  %s524_s14 = sphi %s554_s14, %s15_s14   ;;  %s520_s13 = sphi %s552_s13, %s673_s13   ;;  %s516_s12 = sphi %s550_s12, %s672_s12   ;;  %s512_s11 = sphi %s548_s11, %s671_s11   ;;  %s508_s10 = sphi %s546_s10, %s670_s10   ;;  %s504_s9 = sphi %s544_s9, %s669_s9  }
   0x5   : > { %s27_s17 = sadd.s32 1, %s520_s13  ;;  %s88_s18 = sadd.s32 1, %s512_s11 }
   0x6   : > { %p29_p0 = scmp.ge.s32.totalorder %s27_s17, 3  ;;  %p98_p1 = scmp.ne.s32.totalorder %s512_s11, %s508_s10 }
   0x7   : > { %p99_p2 = scmp.eq.s32.totalorder %s367_s15, 2  ;;  %p104_p3 = scmp.ne.s32.totalorder %s508_s10, %s504_s9 }
   0x8   : > { %s675_s17 = smov (%p29_p0, %s27_s17), 0  ;;  %p105_p5 = scmp.eq.s32.totalorder %s368_s16, 2 }
   0x9   : > { %p584_p4 = por %p99_p2, %p98_p1  ;;  %s83_s20 = ssub.s32 %s520_s13, %s675_s17 }
   0xa   : > { %p372_p6 = scmp.ge.s32.totalorder %s524_s14, 1  ;;  %p86_p7 = scmp.eq.s32.totalorder %s83_s20, 0 }
   0xb   : > { %p591_p8 = por %p105_p5, %p104_p3  ;;  %p139_p9 = scmp.lt.s32.totalorder %s524_s14, 4 }
   0xc   : > { %s597_s22 = scalar_select %p86_p7, %s512_s11, %s88_s18  }
   0xd   : > { %p140_p10 = pnand %p372_p6, %p139_p9 }
   0xe   : > { %p171_p11 = scmp.lt.s32.totalorder (!%p140_p10), %s516_s12, 2  ;;  %s162_s4 = sand.u32 (!%p140_p10), 1, %s508_s10  }
   0xf   : > { %143 = sbr.rel (%p140_p10) target bundleno = 236 (0xec), region = 28  ;;  %s373_s5 = sshll.u32 (!%p140_p10), %s162_s4, 4 }
  0x10   : > { %s164_s6 = scalar_lea.vmem (!%p140_p10), [#allocation2], %s373_s5  ;;  %s382_s8 = sshll.u32 (!%p140_p10), %s516_s12, 8 }
  0x11   : > { %s279_s7 = sshll.u32 (!%p140_p10), %s164_s6, 4  ;;  %s617_s18 = scalar_lea.hbm (!%p140_p10), %s666_s2, %s382_s8  ;;  %s612_s7 = int_to_ptr.vmem [resolvable:$true] %s279_s7 }
  0x12   : > { %s619_s20 = scalar_lea.sflag (!%p140_p10), [#allocation3], %s162_s4  ;;  %s448_s23 = scalar_lea.vmem (!%p140_p10), %s612_s7, 256 }
  0x13   : > { %p449_p12 = scmp.ne.s32.totalorder (!%p140_p10), %s612_s7, %s448_s23 }
  0x14   : > { %v176_v0 = vld [vmem:[%s664_s0] sm:$0xff]  ;;  %vm179_vm0 = vcmask 64512   ;;  %s172_s25 = scalar_select %p171_p11, %s516_s12, 2  ;;  %v177_v2 = vld [vmem:[%s664_s0 + $0x8] sm:$0xff] }
  0x15   : > { %388 = vmatprep.mubr.msk.f32.mxu0 %vm179_vm0, %v176_v0  ;;  %p450_p13 = pnand %p449_p12, %p584_p4  ;;  %s526_s12 = smov [#allocation2]  }
  0x16   : > { %s374_s26 = sshll.u32 %s172_s25, 3  ;;  %s452_s24 = sshll.u32 %s526_s12, 4  ;;  %s453_s24 = int_to_ptr.vmem [resolvable:$false] %s452_s24 }
  0x17   : > { %s174_s29 = scalar_lea.vmem %s665_s1, %s374_s26  ;;  %p451_p0 = pneg %p450_p13 }
  0x18   : > { %v178_v1 = vld [vmem:[%s174_s29] sm:$0xff]  ;;  %s454_s25 = scalar_lea.vmem %s453_s24, 512  ;;  %p455_p1 = scmp.lt.s32.totalorder %s612_s7, %s453_s24 }
  0x19   : > { %386 = vmatprep.subr.mxu0 %v178_v1  ;;  %p456_p2 = scmp.lt.s32.totalorder %s454_s25, %s448_s23 }
  0x1a   : > { %387 = vmatpush3.msra.mxu0 %v178_v1 }
  0x1b   : > { %389 = vmatmul.mubr.msk.f32.vlgmr.msra.gmra.mxu0 %vm179_vm0, %v177_v2  ;;  %p457_p3 = por %p456_p2, %p455_p1 }
  0x1d   : > { %p458_p5 = pnand %p457_p3, %p451_p0 }
  0xdb   : > { %v390_v3 = vpop.f32.mrf.mxu0 }
  0xdc   : > { %262 = vst [vmem:[%s164_s6 + $0x8] sm:$0xff] %v390_v3 }
  0xdd   : > { %v252_v4 = vpop.f32.mrf.mxu0 }
  0xde   : > { %261 = vst [vmem:[%s164_s6] sm:$0xff] %v252_v4 }
  0xdf   : > { %461 = shalt.err (!%p458_p5)
}
  0xe0   : > { %s462_s26 = scalar_lea.hbm %s617_s18, 256  ;;  %s466_s29 = scalar_lea.hbm %s666_s2, 768 }
  0xe1   : > { %p463_p6 = scmp.ne.s32.totalorder %s617_s18, %s462_s26  ;;  %p467_p10 = scmp.lt.s32.totalorder %s617_s18, %s666_s2 }
  0xe2   : > { %p468_p11 = scmp.lt.s32.totalorder %s466_s29, %s462_s26 }
  0xe3   : > { %p464_p7 = pnand %p463_p6, %p584_p4 }
  0xe4   : > { %p469_p12 = por %p468_p11, %p467_p10 }
  0xe5   : > { %p465_p9 = pneg %p464_p7 }
  0xe7   : > { %p470_p13 = pnand %p469_p12, %p465_p9 }
  0xe9   : > { %473 = shalt.err (!%p470_p13)
}
  0xea   : > { %s527_s4 = smov 128   ;;  %s528_s5 = smov 8  }
  0xeb   : > { %391 = dma.vmem_to_hbm [thread:$0]  (%p584_p4), %s612_s7, 256, %s617_s18, %s619_s20, %s527_s4, %s527_s4, %s528_s5  }
  0xec PF: > { %p397_p0 = scmp.ge.s32.totalorder %s524_s14, 2  ;;  %s294_s6 = sand.u32 1, %s504_s9  }
  0xed   : > { %s295_s8 = scalar_lea.sflag [#allocation3], %s294_s6 }
  0xee   : > { %p394_p1 = pnand %p397_p0, %p591_p8 }
  0xf0   : > { %p395_p2 = pneg %p394_p1 }
  0xf2   : > { %499 = dma.done.wait (%p395_p2), %s295_s8, 256  }
  0xf3   : > { %501 = vsyncadd (%p395_p2), %s295_s8, 4294967040  ;;  %s15_s14 = sadd.s32 1, %s524_s14   ;;  %s669_s9 = smov %s508_s10 }
  0xf4   : > { %p12_p3 = scmp.ge.s32.totalorder %s15_s14, 5   ;;  %s670_s10 = smov %s512_s11 }
  0xf5   : > { %s671_s11 = smov %s597_s22  ;;  %s672_s12 = smov %s520_s13 }
  0xf6   : > { %s673_s13 = smov %s675_s17  ;;  %14 = sbr.rel (!%p12_p3) target bundleno = 4 (0x4), region = 66 }
  0xfb   :  { %300 = vsyncpa [#allocation3], 1 }
  0xfc   :  { %302 = vsyncpa [#allocation3 + $0x1], 1 }

</bundles_post_ra>
